<compile_context>
chip_gen: v5e
topology: v5e:2x2
jax: 0.10.0
libtpu: 0.0.40
codegen_flags: <defaults>
</compile_context>

<pallas_src>
import functools

import jax
import jax.numpy as jnp
import numpy as np
from jax import lax
from jax.experimental import pallas as pl
from jax.experimental.pallas import tpu as pltpu


def _rpad8(r):
    """Sublane (8-row) aligned segment size inside the packed param slab."""
    return ((r + 7) // 8) * 8


def lstm_classifier_kernel(x_ref, p_ref, out_ref, *,
                           seq_len, batch, input_size, hidden, kp):
    """Single-layer LSTM (PyTorch gate order i,f,g,o) + Linear head.

    x_ref:   (S*N, I)  sequence-major input, flattened over (seq, batch)
    p_ref:   (R, W)    packed params: [wih_t | whh_t | b_ih+b_hh | wcls_t | bcls]
                       each segment at an 8-row-aligned offset, lane-padded
    out_ref: (S, kp)   logits for out[:, -1] (wrapper slices [:, :K])
    """
    S, N, I, H = seq_len, batch, input_size, hidden
    G = 4 * H

    off_wih = 0
    off_whh = off_wih + _rpad8(I)
    off_b = off_whh + _rpad8(H)
    off_wcls = off_b + 8
    off_bcls = off_wcls + _rpad8(H)

    # One-time loads / casts (prologue, off the recurrent critical path).
    wih = p_ref[off_wih:off_wih + I, :G]                            # (I, 4H) f32
    whh = p_ref[off_whh:off_whh + H, :G].astype(jnp.bfloat16)       # (H, 4H) bf16
    b = p_ref[off_b:off_b + 1, :G]                                  # (1, 4H) f32
    wcls = p_ref[off_wcls:off_wcls + H, :kp].astype(jnp.bfloat16)   # (H, kp) bf16
    bcls = p_ref[off_bcls:off_bcls + 1, :kp]                        # (1, kp) f32

    # Input projection for ALL timesteps.  The contraction dim is only I (=4),
    # i.e. <4% MXU utilisation, so do it as I VPU broadcast-FMAs instead of a
    # matmul.  Combined bias (b_ih + b_hh) is folded in here once.
    x = x_ref[...]                                                  # (S*N, I)
    xg = b + x[:, 0:1] * wih[0:1, :]
    for ci in range(1, I):
        xg = xg + x[:, ci:ci + 1] * wih[ci:ci + 1, :]               # (S*N, 4H)

    h = jnp.zeros((N, H), jnp.float32)
    c = jnp.zeros((N, H), jnp.float32)

    # S (= torch batch dim) is a tiny compile-time constant: fully unroll so
    # adjacent steps' MXU pushes / EUP activations / VPU math interleave.
    # For S beyond ~16, switch to lax.fori_loop(..., unroll=k) with a VMEM
    # (S, H) scratch to bound vreg live ranges and code size.
    for t in range(S):
        gates = (xg[t * N:(t + 1) * N, :]
                 + jnp.dot(h.astype(jnp.bfloat16), whh,
                           preferred_element_type=jnp.float32))     # (N, 4H)

        # Two full-tile EUP activations, then slice (PyTorch order i,f,g,o).
        sg = jax.nn.sigmoid(gates)
        th = jnp.tanh(gates)
        i_g = sg[:, 0:H]
        f_g = sg[:, H:2 * H]
        g_g = th[:, 2 * H:3 * H]
        o_g = sg[:, 3 * H:4 * H]

        c = f_g * c + i_g * g_g
        h = o_g * jnp.tanh(c)

        # torch out[t, -1, :] -> classifier, folded into the loop; this matmul
        # and its lane-dense (1, kp) store are independent of step t+1's
        # recurrence, so they hide under the next h @ Whh matmul.
        logit = (jnp.dot(h[N - 1:N, :].astype(jnp.bfloat16), wcls,
                         preferred_element_type=jnp.float32) + bcls)
        out_ref[t:t + 1, :] = logit


def prepare_params(wih, whh, bih, bhh, wcls, bcls):
    """One-time layout prep (NOT on the per-forward path).

    Transposes the weights, fuses the two LSTM biases, lane-pads the
    classifier and packs everything into a single sublane-aligned (R, W) f32
    slab so the kernel needs exactly one parameter DMA.
    """
    _, I = wih.shape
    H = whh.shape[1]
    K = wcls.shape[0]
    kp = ((K + 127) // 128) * 128
    W = max(4 * H, kp)

    R = _rpad8(I) + _rpad8(H) + 8 + _rpad8(H) + 8
    p = jnp.zeros((R, W), jnp.float32)
    off = 0
    p = p.at[off:off + I, :4 * H].set(jnp.asarray(wih, jnp.float32).T)
    off += _rpad8(I)
    p = p.at[off:off + H, :4 * H].set(jnp.asarray(whh, jnp.float32).T)
    off += _rpad8(H)
    p = p.at[off, :4 * H].set(jnp.asarray(bih + bhh, jnp.float32))
    off += 8
    p = p.at[off:off + H, :K].set(jnp.asarray(wcls, jnp.float32).T)
    off += _rpad8(H)
    p = p.at[off, :K].set(jnp.asarray(bcls, jnp.float32))
    return p


@functools.partial(jax.jit, static_argnames=("hidden_size", "num_classes"))
def simple_lstm_forward(x, packed_params, *, hidden_size, num_classes):
    """x: (B, C, T) float32.  Returns logits of shape (B, num_classes)."""
    B, C, T = x.shape
    S, N, I, H, K = B, T, C, hidden_size, num_classes   # LSTM: seq=B, batch=T
    kp = ((K + 127) // 128) * 128                        # lane-dense out width

    # Layout plumbing for x only; fuses into the pallas_call input operand.
    x2 = jnp.transpose(x, (0, 2, 1)).reshape(S * N, I).astype(jnp.float32)

    vmem = pl.BlockSpec(memory_space=pltpu.MemorySpace.VMEM)
    kernel = functools.partial(lstm_classifier_kernel, seq_len=S, batch=N,
                               input_size=I, hidden=H, kp=kp)

    flops = (2 * S * N * I * 4 * H          # input projection (VPU FMAs)
             + 2 * S * N * H * 4 * H        # recurrence matmuls
             + 2 * S * H * kp)              # classifier
    transcendentals = S * N * (2 * 4 * H + H)
    bytes_accessed = (S * N * I + packed_params.size + S * kp) * 4

    out = pl.pallas_call(
        kernel,
        out_shape=jax.ShapeDtypeStruct((S, kp), jnp.float32),
        in_specs=[vmem, vmem],
        out_specs=vmem,
        compiler_params=pltpu.CompilerParams(
            # Let the (B,C,T)->(S*N,I) transpose fuse into operand 0's DMA.
            allow_input_fusion=[True, False],
        ),
        cost_estimate=pl.CostEstimate(flops=flops,
                                      transcendentals=transcendentals,
                                      bytes_accessed=bytes_accessed),
    )(x2, packed_params)
    return out[:, :K]


def reference_forward(x, wih, whh, bih, bhh, wcls, bcls):
    """Pure-JAX f32 replica of the PyTorch forward, for correctness checking."""
    xp = jnp.transpose(x, (0, 2, 1))       # (S=B, N=T, I=C)
    H = whh.shape[1]
    N = xp.shape[1]
    h0 = jnp.zeros((N, H), jnp.float32)
    c0 = jnp.zeros((N, H), jnp.float32)

    def step(carry, x_t):
        h, c = carry
        gates = x_t @ wih.T + bih + h @ whh.T + bhh
        i = jax.nn.sigmoid(gates[:, 0:H])
        f = jax.nn.sigmoid(gates[:, H:2 * H])
        g = jnp.tanh(gates[:, 2 * H:3 * H])
        o = jax.nn.sigmoid(gates[:, 3 * H:4 * H])
        c = f * c + i * g
        h = o * jnp.tanh(c)
        return (h, c), h

    (_, _), hs = lax.scan(step, (h0, c0), xp)   # hs: (S, N, H)
    out_last = hs[:, -1, :]                     # (S, H) == torch out[:, -1]
    return out_last @ wcls.T + bcls


if __name__ == "__main__":
    # Small shapes consistent with the module: x is (batch, channels, seq).
    B, C, T = 2, 4, 8          # input_size = C = 4
    H = 32                     # hidden_size
    K = 2                      # num_classes

    key = jax.random.PRNGKey(0)
    kx, k1, k2, k3, k4, k5, k6 = jax.random.split(key, 7)
    bound = 1.0 / np.sqrt(H)

    x = jax.random.normal(kx, (B, C, T), dtype=jnp.float32)
    wih = jax.random.uniform(k1, (4 * H, C), jnp.float32, -bound, bound)
    whh = jax.random.uniform(k2, (4 * H, H), jnp.float32, -bound, bound)
    bih = jax.random.uniform(k3, (4 * H,), jnp.float32, -bound, bound)
    bhh = jax.random.uniform(k4, (4 * H,), jnp.float32, -bound, bound)
    wcls = jax.random.uniform(k5, (K, H), jnp.float32, -bound, bound)
    bcls = jax.random.uniform(k6, (K,), jnp.float32, -bound, bound)

    # One-time parameter packing (off the per-forward path).
    packed = jax.block_until_ready(prepare_params(wih, whh, bih, bhh, wcls, bcls))

    out = simple_lstm_forward(x, packed, hidden_size=H, num_classes=K)
    out = jax.block_until_ready(out)

    ref = reference_forward(x, wih, whh, bih, bhh, wcls, bcls)
    # Tolerance loosened vs the pure-f32 kernel: MXU operands are bf16
    # (f32 accumulation, f32 c/h state), per the perf review.
    np.testing.assert_allclose(np.asarray(out), np.asarray(ref),
                               rtol=2e-2, atol=2e-2)
    assert out.shape == (B, K)
    print("KERNEL_OK")
</pallas_src>

<mosaic_0001>
module attributes {stable_mosaic.version = 11 : i64} {
  func.func @lstm_classifier_kernel(%arg0: memref<16x4xf32, #tpu.memory_space<vmem>>, %arg1: memref<88x128xf32, #tpu.memory_space<vmem>>, %arg2: memref<2x128xf32, #tpu.memory_space<vmem>>) attributes {dimension_semantics = [], scalar_prefetch = 0 : i64, scratch_operands = 0 : i64, tpu.core_type = #tpu.core_type<tc>} {
    %c0 = arith.constant 0 : index
    %c0_0 = arith.constant 0 : index
    %0 = vector.load %arg1[%c0, %c0_0] : memref<88x128xf32, #tpu.memory_space<vmem>>, vector<4x128xf32>
    %c8 = arith.constant 8 : index
    %c0_1 = arith.constant 0 : index
    %1 = vector.load %arg1[%c8, %c0_1] : memref<88x128xf32, #tpu.memory_space<vmem>>, vector<32x128xf32>
    %2 = arith.truncf %1 : vector<32x128xf32> to vector<32x128xbf16>
    %c40 = arith.constant 40 : index
    %c0_2 = arith.constant 0 : index
    %3 = vector.load %arg1[%c40, %c0_2] : memref<88x128xf32, #tpu.memory_space<vmem>>, vector<1x128xf32>
    %c48 = arith.constant 48 : index
    %c0_3 = arith.constant 0 : index
    %4 = vector.load %arg1[%c48, %c0_3] : memref<88x128xf32, #tpu.memory_space<vmem>>, vector<32x128xf32>
    %5 = arith.truncf %4 : vector<32x128xf32> to vector<32x128xbf16>
    %c80 = arith.constant 80 : index
    %c0_4 = arith.constant 0 : index
    %6 = vector.load %arg1[%c80, %c0_4] : memref<88x128xf32, #tpu.memory_space<vmem>>, vector<1x128xf32>
    %c0_5 = arith.constant 0 : index
    %c0_6 = arith.constant 0 : index
    %7 = vector.load %arg0[%c0_5, %c0_6] : memref<16x4xf32, #tpu.memory_space<vmem>>, vector<16x4xf32>
    %8 = vector.extract_strided_slice %7 {offsets = [0, 0], sizes = [16, 1], strides = [1, 1]} : vector<16x4xf32> to vector<16x1xf32>
    %9 = vector.extract_strided_slice %0 {offsets = [0, 0], sizes = [1, 128], strides = [1, 1]} : vector<4x128xf32> to vector<1x128xf32>
    %10 = vector.broadcast %8 : vector<16x1xf32> to vector<16x128xf32>
    %11 = vector.broadcast %9 : vector<1x128xf32> to vector<16x128xf32>
    %12 = arith.mulf %10, %11 : vector<16x128xf32>
    %13 = vector.broadcast %3 : vector<1x128xf32> to vector<16x128xf32>
    %14 = arith.addf %13, %12 : vector<16x128xf32>
    %15 = vector.extract_strided_slice %7 {offsets = [0, 1], sizes = [16, 1], strides = [1, 1]} : vector<16x4xf32> to vector<16x1xf32>
    %16 = vector.extract_strided_slice %0 {offsets = [1, 0], sizes = [1, 128], strides = [1, 1]} : vector<4x128xf32> to vector<1x128xf32>
    %17 = vector.broadcast %15 : vector<16x1xf32> to vector<16x128xf32>
    %18 = vector.broadcast %16 : vector<1x128xf32> to vector<16x128xf32>
    %19 = arith.mulf %17, %18 : vector<16x128xf32>
    %20 = arith.addf %14, %19 : vector<16x128xf32>
    %21 = vector.extract_strided_slice %7 {offsets = [0, 2], sizes = [16, 1], strides = [1, 1]} : vector<16x4xf32> to vector<16x1xf32>
    %22 = vector.extract_strided_slice %0 {offsets = [2, 0], sizes = [1, 128], strides = [1, 1]} : vector<4x128xf32> to vector<1x128xf32>
    %23 = vector.broadcast %21 : vector<16x1xf32> to vector<16x128xf32>
    %24 = vector.broadcast %22 : vector<1x128xf32> to vector<16x128xf32>
    %25 = arith.mulf %23, %24 : vector<16x128xf32>
    %26 = arith.addf %20, %25 : vector<16x128xf32>
    %27 = vector.extract_strided_slice %7 {offsets = [0, 3], sizes = [16, 1], strides = [1, 1]} : vector<16x4xf32> to vector<16x1xf32>
    %28 = vector.extract_strided_slice %0 {offsets = [3, 0], sizes = [1, 128], strides = [1, 1]} : vector<4x128xf32> to vector<1x128xf32>
    %29 = vector.broadcast %27 : vector<16x1xf32> to vector<16x128xf32>
    %30 = vector.broadcast %28 : vector<1x128xf32> to vector<16x128xf32>
    %31 = arith.mulf %29, %30 : vector<16x128xf32>
    %32 = arith.addf %26, %31 : vector<16x128xf32>
    %cst = arith.constant 0.000000e+00 : f32
    %33 = vector.broadcast %cst : f32 to vector<8x32xf32>
    %cst_7 = arith.constant 0.000000e+00 : f32
    %34 = vector.broadcast %cst_7 : f32 to vector<8x32xf32>
    %35 = vector.extract_strided_slice %32 {offsets = [0, 0], sizes = [8, 128], strides = [1, 1]} : vector<16x128xf32> to vector<8x128xf32>
    %36 = arith.truncf %33 : vector<8x32xf32> to vector<8x32xbf16>
    %cst_8 = arith.constant dense<0.000000e+00> : vector<8x128xf32>
    %37 = tpu.matmul %36, %2, %cst_8 {dimension_numbers = #tpu.dot_dimension_numbers<[1], [0], [0], [1], [0, 0, 1, 1], [], []>} : vector<8x32xbf16>, vector<32x128xbf16>, vector<8x128xf32> -> vector<8x128xf32>
    %38 = arith.addf %35, %37 : vector<8x128xf32>
    %39 = arith.negf %38 : vector<8x128xf32>
    %40 = math.exp %39 : vector<8x128xf32>
    %cst_9 = arith.constant 1.000000e+00 : f32
    %41 = vector.broadcast %cst_9 : f32 to vector<8x128xf32>
    %42 = arith.addf %41, %40 : vector<8x128xf32>
    %43 = arith.divf %41, %42 : vector<8x128xf32>
    %44 = math.tanh %38 : vector<8x128xf32>
    %45 = vector.extract_strided_slice %43 {offsets = [0, 0], sizes = [8, 32], strides = [1, 1]} : vector<8x128xf32> to vector<8x32xf32>
    %46 = vector.extract_strided_slice %43 {offsets = [0, 32], sizes = [8, 32], strides = [1, 1]} : vector<8x128xf32> to vector<8x32xf32>
    %47 = vector.extract_strided_slice %44 {offsets = [0, 64], sizes = [8, 32], strides = [1, 1]} : vector<8x128xf32> to vector<8x32xf32>
    %48 = vector.extract_strided_slice %43 {offsets = [0, 96], sizes = [8, 32], strides = [1, 1]} : vector<8x128xf32> to vector<8x32xf32>
    %49 = arith.mulf %46, %34 : vector<8x32xf32>
    %50 = arith.mulf %45, %47 : vector<8x32xf32>
    %51 = arith.addf %49, %50 : vector<8x32xf32>
    %52 = math.tanh %51 : vector<8x32xf32>
    %53 = arith.mulf %48, %52 : vector<8x32xf32>
    %54 = vector.extract_strided_slice %53 {offsets = [7, 0], sizes = [1, 32], strides = [1, 1]} : vector<8x32xf32> to vector<1x32xf32>
    %55 = arith.truncf %54 : vector<1x32xf32> to vector<1x32xbf16>
    %cst_10 = arith.constant dense<0.000000e+00> : vector<1x128xf32>
    %56 = tpu.matmul %55, %5, %cst_10 {dimension_numbers = #tpu.dot_dimension_numbers<[1], [0], [0], [1], [0, 0, 1, 1], [], []>} : vector<1x32xbf16>, vector<32x128xbf16>, vector<1x128xf32> -> vector<1x128xf32>
    %57 = arith.addf %56, %6 : vector<1x128xf32>
    %c0_11 = arith.constant 0 : index
    %c0_12 = arith.constant 0 : index
    %58 = vector.load %arg2[%c0_11, %c0_12] : memref<2x128xf32, #tpu.memory_space<vmem>>, vector<1x128xf32>
    tpu.vector_store %arg2[%c0_11, %c0_12], %57 {strides = array<i32>} : memref<2x128xf32, #tpu.memory_space<vmem>>, vector<1x128xf32>,
    %59 = vector.extract_strided_slice %32 {offsets = [8, 0], sizes = [8, 128], strides = [1, 1]} : vector<16x128xf32> to vector<8x128xf32>
    %60 = arith.truncf %53 : vector<8x32xf32> to vector<8x32xbf16>
    %cst_13 = arith.constant dense<0.000000e+00> : vector<8x128xf32>
    %61 = tpu.matmul %60, %2, %cst_13 {dimension_numbers = #tpu.dot_dimension_numbers<[1], [0], [0], [1], [0, 0, 1, 1], [], []>} : vector<8x32xbf16>, vector<32x128xbf16>, vector<8x128xf32> -> vector<8x128xf32>
    %62 = arith.addf %59, %61 : vector<8x128xf32>
    %63 = arith.negf %62 : vector<8x128xf32>
    %64 = math.exp %63 : vector<8x128xf32>
    %cst_14 = arith.constant 1.000000e+00 : f32
    %65 = vector.broadcast %cst_14 : f32 to vector<8x128xf32>
    %66 = arith.addf %65, %64 : vector<8x128xf32>
    %67 = arith.divf %65, %66 : vector<8x128xf32>
    %68 = math.tanh %62 : vector<8x128xf32>
    %69 = vector.extract_strided_slice %67 {offsets = [0, 0], sizes = [8, 32], strides = [1, 1]} : vector<8x128xf32> to vector<8x32xf32>
    %70 = vector.extract_strided_slice %67 {offsets = [0, 32], sizes = [8, 32], strides = [1, 1]} : vector<8x128xf32> to vector<8x32xf32>
    %71 = vector.extract_strided_slice %68 {offsets = [0, 64], sizes = [8, 32], strides = [1, 1]} : vector<8x128xf32> to vector<8x32xf32>
    %72 = vector.extract_strided_slice %67 {offsets = [0, 96], sizes = [8, 32], strides = [1, 1]} : vector<8x128xf32> to vector<8x32xf32>
    %73 = arith.mulf %70, %51 : vector<8x32xf32>
    %74 = arith.mulf %69, %71 : vector<8x32xf32>
    %75 = arith.addf %73, %74 : vector<8x32xf32>
    %76 = math.tanh %75 : vector<8x32xf32>
    %77 = arith.mulf %72, %76 : vector<8x32xf32>
    %78 = vector.extract_strided_slice %77 {offsets = [7, 0], sizes = [1, 32], strides = [1, 1]} : vector<8x32xf32> to vector<1x32xf32>
    %79 = arith.truncf %78 : vector<1x32xf32> to vector<1x32xbf16>
    %cst_15 = arith.constant dense<0.000000e+00> : vector<1x128xf32>
    %80 = tpu.matmul %79, %5, %cst_15 {dimension_numbers = #tpu.dot_dimension_numbers<[1], [0], [0], [1], [0, 0, 1, 1], [], []>} : vector<1x32xbf16>, vector<32x128xbf16>, vector<1x128xf32> -> vector<1x128xf32>
    %81 = arith.addf %80, %6 : vector<1x128xf32>
    %c1 = arith.constant 1 : index
    %c0_16 = arith.constant 0 : index
    %82 = vector.load %arg2[%c1, %c0_16] : memref<2x128xf32, #tpu.memory_space<vmem>>, vector<1x128xf32>
    tpu.vector_store %arg2[%c1, %c0_16], %81 {strides = array<i32>} : memref<2x128xf32, #tpu.memory_space<vmem>>, vector<1x128xf32>,
    return
  }
}

</mosaic_0001>

<bundles_post_ra>
// kernel: simple_lstm_forward.2
= control target key start
LH: loop header
LB: loop body
LE: loop exit
PB: predicated region body
PF: predicated region fallthrough
CT: control target
= control target key end

     0   :  { %7 = vsyncpa [#allocation3], 0  ;;  %s464_s0 = inlined_call_operand.hbm [shape: f32[88,128], index: 0, kind: input, shape index: {}]   ;;  %s465_s1 = inlined_call_operand.vmem [shape: f32[2,8,4], index: 1, kind: input, shape index: {}]   ;;  %s466_s2 = inlined_call_operand.hbm [shape: f32[2,128], index: 2, kind: output, shape index: {}]  }
   0x1   :  { %8 = vsyncpa [#allocation4], 0  ;;  %s15_s11 = sshll.u32 %s464_s0, 4  ;;  %s382_s12 = smov [#allocation2]   ;;  %s16_s11 = int_to_ptr.hbm [resolvable:$true] %s15_s11 }
   0x2   :  { %s17_s13 = sshll.u32 %s382_s12, 4  ;;  %s383_s14 = smov 128   ;;  %s18_s13 = int_to_ptr.vmem [resolvable:$true] %s17_s13 }
   0x3   :  { %s384_s15 = smov 8  }
   0x4   :  { %23 = dma.hbm_to_vmem [thread:$0]  %s16_s11, 1408, %s18_s13, [#allocation3], %s383_s14, %s383_s14, %s384_s15  }
   0x5   :  { %378 = dma.done.wait [#allocation3], 1408  }
   0x6   :  { %379 = vsyncadd [#allocation3], 4294965888  ;;  %v385_v0 = vmov 0   ;;  %v386_v1 = vmov 2   ;;  %v28_v2 = vld [vmem:[%s465_s1] sm:$0xff]  ;;  %v42_v3 = vld [vmem:[#allocation2 + $0x18] sm:$0xff] }
   0x7   :  { %304 = vset.pattern.permute.xlu0 %v385_v0  ;;  %306 = vset.pattern.permute.xlu1 %v386_v1  ;;  %v43_v4 = vld [vmem:[#allocation2 + $0x20] sm:$0xff]  ;;  %v40_v6 = vld [vmem:[#allocation2 + $0x8] sm:$0xff]  ;;  %v41_v7 = vld [vmem:[#allocation2 + $0x10] sm:$0xff]  ;;  %v387_v9 = vmov 1   ;;  %v388_v10 = vmov 3   ;;  %s389_s0 = smov 64  }
   0x8   :  { %310 = vset.pattern.permute.xlu2 %v386_v1  ;;  %58 = vperm.xlu0 %304, %v28_v2   ;;  %v45_v5 = vpack.c.bf16 %v43_v4, %v42_v3  ;;  %v44_v8 = vpack.c.bf16 %v41_v7, %v40_v6  ;;  %v414_v11 = vld [vmem:[#allocation2] sm:$0xf]  ;;  %v417_v15 = vld [vmem:[#allocation2 + $0x28] ss:$0 sm:$0xff]  ;;  %s390_s18 = smov 32   ;;  %vm111_vm4 = vcmask 261120  }
   0x9   :  { %86 = vperm.xlu1 %306, %v28_v2   ;;  %v66_v13 = vperm.slane %v414_v11, 0  ;;  %v80_v17 = vperm.slane %v414_v11, 1  ;;  %v93_v18 = vperm.slane %v414_v11, 2  ;;  %v106_v22 = vperm.slane %v414_v11, 3  ;;  %v288_v52 = vld [vmem:[%s465_s1 + $0x8] sm:$0xff]  ;;  %s391_s1 = smov [#allocation5]  }
   0xa   :  { %121 = vmatpush.bf16.msra.mxu0 %v45_v5  ;;  %202 = vmatpush.bf16.msra.mxu2 %v45_v5  ;;  %s276_s21 = sshll.u32 %s391_s1, 4  ;;  %s278_s24 = sshll.u32 %s466_s2, 4  ;;  %s277_s21 = int_to_ptr.vmem [resolvable:$true] %s276_s21  ;;  %s279_s24 = int_to_ptr.hbm [resolvable:$true] %s278_s24 }
   0xe   :  { %122 = vmatpush.bf16.msra.mxu0 %v44_v8  ;;  %203 = vmatpush.bf16.msra.mxu2 %v44_v8 }
  0x10   :  { %305 = vset.pattern.permute.xlu0 %v387_v9 }
  0x11   :  { %307 = vset.pattern.permute.xlu1 %v388_v10  ;;  %123 = vmatmul.bf16.vlgmr.msra.gmra.mxu0 %v385_v0 }
  0x12   :  { %73 = vperm.xlu0 %305, %v28_v2   ;;  %99 = vperm.xlu1 %307, %v28_v2  }
  0x1a   :  { %308 = vset.pattern.permute.xlu0 %v385_v0  ;;  %309 = vset.pattern.permute.xlu1 %v387_v9 }
  0x1b   :  { %63 = vperm.xlu0 %308, %v288_v52  }
  0x23   :  { %312 = vset.pattern.permute.xlu0 %v388_v10 }
  0x7a   :  { %v59_v12 = vpop.permute.xlu0 %58 }
  0x7b   :  { %v87_v14 = vpop.permute.xlu1 %86  ;;  %v67_v16 = vmul.f32 %v66_v13, %v59_v12 }
  0x7c   :  { %v94_v25 = vmul.f32 %v93_v18, %v87_v14 }
  0x7d   :  { %v70_v20 = vadd.f32 %v417_v15, %v67_v16 }
  0x84   :  { %v74_v19 = vpop.permute.xlu0 %73  ;;  %v100_v24 = vpop.permute.xlu1 %99 }
  0x85   :  { %v81_v21 = vmul.f32 %v80_v17, %v74_v19  ;;  %v107_v26 = vmul.f32 %v106_v22, %v100_v24 }
  0x87   :  { %v83_v23 = vadd.f32 %v81_v21, %v70_v20 }
  0x89   :  { %v96_v27 = vadd.f32 %v94_v25, %v83_v23 }
  0x8b   :  { %v109_v28 = vadd.f32 %v107_v26, %v96_v27  ;;  %v49_v26 = vld [vmem:[#allocation2 + $0x40] sm:$0xff]  ;;  %v50_v27 = vld [vmem:[#allocation2 + $0x48] sm:$0xff] }
  0x8d   :  { %v64_v57 = vpop.permute.xlu0 %63 }
  0x8e   :  { %v124_v29 = vpop.f32.mrf.mxu0  ;;  %v68_v59 = vmul.f32 %v66_v13, %v64_v57 }
  0x8f   :  { %v128_v30 = vadd.f32 %v124_v29, %v109_v28  ;;  %v52_v28 = vpack.c.bf16 %v50_v27, %v49_v26  ;;  %v47_v29 = vld [vmem:[#allocation2 + $0x30] sm:$0xff] }
  0x90   :  { %v71_v61 = vadd.f32 %v417_v15, %v68_v59 }
  0x91   :  { %314 = vtanh.f32 %v128_v30  ;;  %v289_v33 = vmul.f32 -1.442695, %v128_v30  ;;  %182 = vmatpush.bf16.msra.mxu1 %v52_v28  ;;  %263 = vmatpush.bf16.msra.mxu3 %v52_v28  ;;  %v48_v30 = vld [vmem:[#allocation2 + $0x38] sm:$0xff] }
  0x93   :  { %316 = vpow2.f32 %v289_v33 }
  0x96   :  { %v126_v31 = vpop.f32.mrf.mxu0 }
  0x97   :  { %v315_v32 = vpop.eup %314  ;;  %v51_v31 = vpack.c.bf16 %v48_v30, %v47_v29 }
  0x98   :  { %151 = vrot.lane.b32.xlu2 %v315_v32, %s389_s0 }
  0x99   :  { %v317_v34 = vpop.eup %316  ;;  %183 = vmatpush.bf16.msra.mxu1 %v51_v31  ;;  %264 = vmatpush.bf16.msra.mxu3 %v51_v31 }
  0x9a   :  { %v132_v35 = vadd.f32 1.0, %v317_v34 }
  0x9c   :  { %318 = vrcp.f32 %v132_v35  ;;  %v144_v41 = vand.u32 2147483648, %v132_v35  ;;  %vm138_vm1 = vweird.f32 %v132_v35  ;;  %v142_v42 = vand.u32 2147483647, %v132_v35 }
  0x9e   :  { %v145_v44 = vor.u32 1.1754944e-38, %v144_v41  ;;  %vm143_vm3 = vcmp.eq.f32.partialorder %v142_v42, 8.507059e+37  ;;  %v53_v42 = vld [vmem:[#allocation2 + $0x50] sm:$0x1] }
  0xa2   :  { %v319_v36 = vpop.eup %318 }
  0xa3   :  { %v134_v37 = vmul.f32 %v319_v36, %v132_v35  ;;  %vm139_vm0 = vweird.f32 %v319_v36 }
  0xa4   :  { %vm140_vm2 = vmor %vm138_vm1, %vm139_vm0 }
  0xa5   :  { %v135_v38 = vsub.f32 1.0, %v134_v37 }
  0xa7   :  { %v136_v39 = vmul.f32 %v319_v36, %v135_v38 }
  0xa9   :  { %v137_v40 = vadd.f32 %v319_v36, %v136_v39 }
  0xab   :  { %v141_v43 = vsel %vm140_vm2, %v319_v36, %v137_v40 }
  0xac   :  { %v146_v46 = vsel %vm143_vm3, %v145_v44, %v141_v43 }
  0xad   :  { %v149_v48 = vmul.f32 0.0, %v146_v46 }
  0xf2   :  { %v152_v45 = vpop.permute.xlu2 %151 }
  0xf3   :  { %v154_v47 = vmul.f32 %v152_v45, %v146_v46 }
  0xf5   :  { %156 = vrot.lane.b32.xlu2 %v154_v47, %s390_s18 }
 0x14f   :  { %v157_v49 = vpop.permute.xlu2 %156 }
 0x150   :  { %v433_v50 = vadd.f32 %v157_v49, %v149_v48 }
 0x152   :  { %320 = vtanh.f32 %v433_v50 }
 0x158   :  { %v321_v51 = vpop.eup %320 }
 0x159   :  { %162 = vrot.lane.b32.xlu1 %v321_v51, %s389_s0 }
 0x161   :  { %77 = vperm.xlu1 %309, %v288_v52  }
 0x169   :  { %311 = vset.pattern.permute.xlu1 %v388_v10 }
 0x16a   :  { %103 = vperm.xlu1 %311, %v288_v52  }
 0x1cb   :  { %v163_v53 = vpop.permute.xlu1 %162 }
 0x1cc   :  { %v165_v54 = vmul.f32 %v163_v53, %v146_v46 }
 0x1ce   :  { %v166_v55 = vpack.c.bf16 %v165_v54, %v165_v54 }
 0x1d0   :  { %191 = vrot.lane.b32.xlu2 %v166_v55, %s390_s18  ;;  %v168_v24 = vshrl.u32 %v166_v55, 16 }
 0x1d2   :  { %v170_v25 = vrot.slane %v168_v24, 3 }
 0x1d3   :  { %v78_v58 = vpop.permute.xlu1 %77 }
 0x1d4   :  { %v82_v60 = vmul.f32 %v80_v17, %v78_v58 }
 0x1d6   :  { %v84_v63 = vadd.f32 %v82_v60, %v71_v61 }
 0x1d8   :  { %90 = vperm.xlu2 %310, %v288_v52  }
 0x1dc   :  { %v104_v1 = vpop.permute.xlu1 %103 }
 0x1dd   :  { %v108_v3 = vmul.f32 %v106_v22, %v104_v1 }
 0x22a   :  { %v192_v56 = vpop.permute.xlu2 %191 }
 0x22b   :  { %291 = vmatmul.msk.bf16.vlgmr.msra.gmra.mxu2 %vm111_vm4, %v192_v56 }
 0x232   :  { %v91_v62 = vpop.permute.xlu2 %90 }
 0x233   :  { %v95_v0 = vmul.f32 %v93_v18, %v91_v62 }
 0x235   :  { %v97_v2 = vadd.f32 %v95_v0, %v84_v63 }
 0x237   :  { %v110_v4 = vadd.f32 %v108_v3, %v97_v2 }
 0x2ae   :  { %v205_v5 = vpop.f32.mrf.mxu2 }
 0x2af   :  { %v209_v6 = vadd.f32 %v205_v5, %v110_v4 }
 0x2b1   :  { %322 = vtanh.f32 %v209_v6  ;;  %v292_v9 = vmul.f32 -1.442695, %v209_v6 }
 0x2b3   :  { %324 = vpow2.f32 %v292_v9 }
 0x2b6   :  { %v207_v7 = vpop.f32.mrf.mxu2 }
 0x2b7   :  { %v323_v8 = vpop.eup %322 }
 0x2b8   :  { %232 = vrot.lane.b32.xlu2 %v323_v8, %s389_s0 }
 0x2b9   :  { %v325_v10 = vpop.eup %324 }
 0x2ba   :  { %v213_v12 = vadd.f32 1.0, %v325_v10 }
 0x2bc   :  { %326 = vrcp.f32 %v213_v12  ;;  %v225_v11 = vand.u32 2147483648, %v213_v12  ;;  %vm219_vm6 = vweird.f32 %v213_v12  ;;  %v223_v18 = vand.u32 2147483647, %v213_v12 }
 0x2be   :  { %v226_v20 = vor.u32 1.1754944e-38, %v225_v11  ;;  %vm224_vm8 = vcmp.eq.f32.partialorder %v223_v18, 8.507059e+37 }
 0x2c2   :  { %v327_v13 = vpop.eup %326 }
 0x2c3   :  { %v215_v14 = vmul.f32 %v327_v13, %v213_v12  ;;  %vm220_vm5 = vweird.f32 %v327_v13 }
 0x2c4   :  { %vm221_vm7 = vmor %vm219_vm6, %vm220_vm5 }
 0x2c5   :  { %v216_v15 = vsub.f32 1.0, %v215_v14 }
 0x2c7   :  { %v217_v16 = vmul.f32 %v327_v13, %v216_v15 }
 0x2c9   :  { %v218_v17 = vadd.f32 %v327_v13, %v217_v16 }
 0x2cb   :  { %v222_v19 = vsel %vm221_vm7, %v327_v13, %v218_v17 }
 0x2cc   :  { %v227_v22 = vsel %vm224_vm8, %v226_v20, %v222_v19 }
 0x2cd   :  { %v230_v32 = vmul.f32 %v227_v22, %v433_v50 }
 0x312   :  { %v233_v21 = vpop.permute.xlu2 %232 }
 0x313   :  { %v235_v23 = vmul.f32 %v233_v21, %v227_v22 }
 0x315   :  { %237 = vrot.lane.b32.xlu0 %v235_v23, %s390_s18 }
 0x31d   :  { %171 = vrot.lane.b32.xlu0 %v170_v25, %s390_s18 }
 0x387   :  { %v238_v33 = vpop.permute.xlu0 %237 }
 0x388   :  { %v240_v34 = vadd.f32 %v238_v33, %v230_v32 }
 0x38a   :  { %328 = vtanh.f32 %v240_v34 }
 0x38f   :  { %v172_v35 = vpop.permute.xlu0 %171 }
 0x390   :  { %v329_v36 = vpop.eup %328  ;;  %290 = vmatmul.msk.bf16.vlgmr.msra.gmra.mxu1 %vm111_vm4, %v172_v35 }
 0x391   :  { %243 = vrot.lane.b32.xlu1 %v329_v36, %s389_s0 }
 0x403   :  { %v244_v37 = vpop.permute.xlu1 %243 }
 0x404   :  { %v246_v38 = vmul.f32 %v244_v37, %v227_v22 }
 0x406   :  { %v247_v39 = vpack.c.bf16 %v246_v38, %v246_v38 }
 0x408   :  { %v249_v40 = vshrl.u32 %v247_v39, 16 }
 0x40a   :  { %v251_v41 = vrot.slane %v249_v40, 3 }
 0x40c   :  { %252 = vrot.lane.b32.xlu2 %v251_v41, %s390_s18 }
 0x40d   :  { %v185_v43 = vpop.f32.mrf.mxu1 }
 0x40e   :  { %v186_v44 = vadd.f32 %v185_v43, %v53_v42 }
 0x410   :  { %189 = vst [vmem:[#allocation5] sm:$0x1] %v186_v44 }
 0x415   :  { %v187_v45 = vpop.f32.mrf.mxu1 }
 0x466   :  { %v253_v46 = vpop.permute.xlu2 %252 }
 0x467   :  { %293 = vmatmul.msk.bf16.vlgmr.msra.gmra.mxu3 %vm111_vm4, %v253_v46 }
 0x4ea   :  { %v266_v47 = vpop.f32.mrf.mxu3 }
 0x4eb   :  { %v267_v48 = vadd.f32 %v266_v47, %v53_v42 }
 0x4ed   :  { %270 = vst [vmem:[#allocation5 + $0x1] sm:$0x1] %v267_v48 }
 0x4ee   :  { %281 = dma.vmem_to_hbm [thread:$0]  %s277_s21, 32, %s279_s24, [#allocation4]  }
 0x4f2   :  { %v268_v49 = vpop.f32.mrf.mxu3 }
 0x4f3   :  { %380 = dma.done.wait [#allocation4], 32  }
 0x4f4   :  { %381 = vsyncadd [#allocation4], 4294967264 }
 0x4f5   :  { %286 = vsyncpa [#allocation3], 1 }
 0x4f6   :  { %287 = vsyncpa [#allocation4], 1 }

</bundles_post_ra>
